<compile_context>
chip_gen: v7x
topology: tpu7x:2x2x1
jax: 0.10.0
libtpu: 0.0.40
codegen_flags: <defaults>
</compile_context>

<pallas_src>
import math
import functools

import numpy as np
import jax
import jax.numpy as jnp
from jax import lax
from jax.experimental import pallas as pl
from jax.experimental.pallas import tpu as pltpu

F32 = jnp.float32


def _round_up(x, m):
    return ((x + m - 1) // m) * m


# ---------------------------------------------------------------------------
# In-kernel math helpers
# ---------------------------------------------------------------------------
def _erf(x):
    # Abramowitz & Stegun 7.1.26 (f32-accurate), Mosaic-supported ops only.
    a1, a2, a3, a4, a5 = 0.254829592, -0.284496736, 1.421413741, -1.453152027, 1.061405429
    p = 0.3275911
    ax = jnp.abs(x)
    t = 1.0 / (1.0 + p * ax)
    poly = ((((a5 * t + a4) * t + a3) * t + a2) * t + a1) * t
    y = 1.0 - poly * jnp.exp(-ax * ax)
    return jnp.where(x >= 0, y, -y)


def _gelu_exact(x):
    return 0.5 * x * (1.0 + _erf(x * 0.7071067811865476))


# ---------------------------------------------------------------------------
# Linear (matmul + bias [+ affine] [+ GELU]) kernel, M-tiled / parallel grid
# ---------------------------------------------------------------------------
def _linear_kernel(x_ref, w_ref, b_ref, s_ref, t_ref, o_ref, *, gelu, affine):
    acc = jnp.dot(x_ref[...], w_ref[...], preferred_element_type=jnp.float32)
    acc = acc + b_ref[...]
    if affine:                       # folded eval-BatchNorm epilogue
        acc = acc * s_ref[...] + t_ref[...]
    if gelu:
        acc = _gelu_exact(acc)
    o_ref[...] = acc.astype(o_ref.dtype)


@functools.lru_cache(maxsize=None)
def _build_linear(Mp, K, N, gelu, affine, tm):
    kern = functools.partial(_linear_kernel, gelu=gelu, affine=affine)
    return pl.pallas_call(
        kern,
        out_shape=jax.ShapeDtypeStruct((Mp, N), F32),
        grid=(Mp // tm,),
        in_specs=[
            pl.BlockSpec((tm, K), lambda i: (i, 0)),
            pl.BlockSpec((K, N), lambda i: (0, 0)),
            pl.BlockSpec((1, N), lambda i: (0, 0)),
            pl.BlockSpec((1, N), lambda i: (0, 0)),
            pl.BlockSpec((1, N), lambda i: (0, 0)),
        ],
        out_specs=pl.BlockSpec((tm, N), lambda i: (i, 0)),
        compiler_params=pltpu.CompilerParams(dimension_semantics=("parallel",)),
    )


def pallas_linear(x, w, b, *, gelu=False, scale=None, shift=None):
    """(M,K)@(K,N)+b with optional fused affine (eval-BN) and exact GELU epilogues."""
    M, K = x.shape
    Kw, N = w.shape
    assert K == Kw
    affine = scale is not None
    b2 = jnp.asarray(b, F32).reshape(1, N)
    s2 = jnp.asarray(scale, F32).reshape(1, N) if affine else jnp.ones((1, N), F32)
    t2 = jnp.asarray(shift, F32).reshape(1, N) if affine else jnp.zeros((1, N), F32)
    # M-tiling: rows split across grid steps (and across TCs on v7x megacore).
    tm = 256 if M > 256 else M
    Mp = _round_up(M, tm)
    xp = x if Mp == M else jnp.pad(x, ((0, Mp - M), (0, 0)))
    out = _build_linear(Mp, K, N, bool(gelu), bool(affine), tm)(
        xp.astype(F32), w.astype(F32), b2, s2, t2)
    return out[:M] if Mp != M else out


# ---------------------------------------------------------------------------
# Fused TimesBlock conv stack: (Inception conv1 + bias + GELU) -> VMEM scratch
# -> (Inception conv2 + bias), all k period branches in ONE pallas_call.
# Layout trick: the spatially zero-padded grid (Hpp, Wpp) is flattened to rows;
# a tap (dy, dx) becomes a constant row shift dy*Wpp+dx, so the conv is a sum of
# KH*KW shifted (rows, Cin)@(Cin, Cout) matmuls — no HBM im2col.
# ---------------------------------------------------------------------------
def _make_inception_kernel(geoms, kmax, Cin, Cff, Cout):
    kk = kmax * kmax
    nper = len(geoms)

    def kernel(*refs):
        x_refs = refs[0:nper]
        m_refs = refs[nper:2 * nper]
        w1_ref, b1_ref, w2_ref, b2_ref = refs[2 * nper:2 * nper + 4]
        o_refs = refs[2 * nper + 4:2 * nper + 4 + nper]
        mid_ref = refs[-1]

        for pi in range(nper):
            Wpp, Rpw, start, base = geoms[pi]
            x_ref, m_ref, o_ref = x_refs[pi], m_refs[pi], o_refs[pi]

            # ---- conv1 (Inception average kernel) + bias + GELU, valid-ring masked
            acc = jnp.zeros((Rpw, Cff), jnp.float32)
            for t in range(kk):
                dy, dx = t // kmax, t % kmax
                off = start - base + dy * Wpp + dx
                acc = acc + jnp.dot(x_ref[0, off:off + Rpw, :],
                                    w1_ref[t * Cin:(t + 1) * Cin, :],
                                    preferred_element_type=jnp.float32)
            act = _gelu_exact(acc + b1_ref[...]) * m_ref[...]

            # ---- stage intermediate in VMEM scratch with a zero halo (conv2 padding)
            mid_ref[...] = jnp.zeros(mid_ref.shape, jnp.float32)
            mid_ref[start:start + Rpw, :] = act

            # ---- conv2 + bias
            acc2 = jnp.zeros((Rpw, Cout), jnp.float32)
            for t in range(kk):
                dy, dx = t // kmax, t % kmax
                off = start - base + dy * Wpp + dx
                acc2 = acc2 + jnp.dot(mid_ref[off:off + Rpw, :],
                                      w2_ref[t * Cff:(t + 1) * Cff, :],
                                      preferred_element_type=jnp.float32)
            o_ref[0, :, :] = (acc2 + b2_ref[...]).astype(o_ref.dtype)

    return kernel


@functools.lru_cache(maxsize=None)
def _build_inception_call(geoms, rws, kmax, Cin, Cff, Cout, BW):
    nper = len(geoms)
    kern = _make_inception_kernel(geoms, kmax, Cin, Cff, Cout)
    mid_rows = max(_round_up(g[2] + g[3] + g[1], 8) for g in geoms)  # start+base+Rpw

    in_specs = []
    for pi in range(nper):                      # flattened, halo-padded inputs
        rw = rws[pi]
        in_specs.append(pl.BlockSpec((1, rw, Cin), lambda b: (b, 0, 0)))
    for pi in range(nper):                      # valid-ring masks (static, broadcast)
        Rpw = geoms[pi][1]
        in_specs.append(pl.BlockSpec((Rpw, 1), lambda b: (0, 0)))
    in_specs += [
        pl.BlockSpec((kmax * kmax * Cin, Cff), lambda b: (0, 0)),
        pl.BlockSpec((1, Cff), lambda b: (0, 0)),
        pl.BlockSpec((kmax * kmax * Cff, Cout), lambda b: (0, 0)),
        pl.BlockSpec((1, Cout), lambda b: (0, 0)),
    ]
    out_specs = tuple(
        pl.BlockSpec((1, geoms[pi][1], Cout), lambda b: (b, 0, 0)) for pi in range(nper))
    out_shape = tuple(
        jax.ShapeDtypeStruct((BW, geoms[pi][1], Cout), F32) for pi in range(nper))

    return pl.pallas_call(
        kern,
        out_shape=out_shape,
        grid=(BW,),
        in_specs=in_specs,
        out_specs=out_specs,
        scratch_shapes=[pltpu.VMEM((mid_rows, Cff), jnp.float32)],
        compiler_params=pltpu.CompilerParams(dimension_semantics=("parallel",)),
    )


# ---------------------------------------------------------------------------
# Combine (weighted residual sum) + LayerNorm [+ eval-BN1 + GELU] kernel.
# Gridded over windows; softmax(period_weight) comes in as an SMEM table.
# ---------------------------------------------------------------------------
def _make_combine_ln_kernel(k, eps, post):
    def kernel(*refs):
        pw_ref = refs[0]
        res_refs = refs[1:1 + k]
        x_ref, g_ref, bb_ref, s_ref, t_ref = refs[1 + k:1 + k + 5]
        o_ref = refs[1 + k + 5]
        b = pl.program_id(0)
        acc = x_ref[0].astype(jnp.float32)
        for i in range(k):
            acc = acc + res_refs[i][0].astype(jnp.float32) * pw_ref[b, i]
        mu = jnp.mean(acc, axis=-1, keepdims=True)
        var = jnp.mean((acc - mu) ** 2, axis=-1, keepdims=True)
        y = (acc - mu) * lax.rsqrt(var + eps) * g_ref[...] + bb_ref[...]
        if post:                      # fused eval-BatchNorm1d + GELU epilogue
            y = _gelu_exact(y * s_ref[...] + t_ref[...])
        o_ref[0] = y.astype(o_ref.dtype)

    return kernel


@functools.lru_cache(maxsize=None)
def _build_combine_ln(k, BW, T, N, eps, post):
    kern = _make_combine_ln_kernel(k, eps, post)
    in_specs = (
        [pl.BlockSpec(memory_space=pltpu.MemorySpace.SMEM)]
        + [pl.BlockSpec((1, T, N), lambda b: (b, 0, 0)) for _ in range(k)]
        + [pl.BlockSpec((1, T, N), lambda b: (b, 0, 0)),
           pl.BlockSpec((1, N), lambda b: (0, 0)),
           pl.BlockSpec((1, N), lambda b: (0, 0)),
           pl.BlockSpec((1, N), lambda b: (0, 0)),
           pl.BlockSpec((1, N), lambda b: (0, 0))]
    )
    return pl.pallas_call(
        kern,
        out_shape=jax.ShapeDtypeStruct((BW, T, N), F32),
        grid=(BW,),
        in_specs=in_specs,
        out_specs=pl.BlockSpec((1, T, N), lambda b: (b, 0, 0)),
        compiler_params=pltpu.CompilerParams(dimension_semantics=("parallel",)),
    )


def pallas_combine_layernorm(res_list, pw, x, gamma, beta, eps=1e-5,
                             post_scale=None, post_shift=None):
    BW, T, N = x.shape
    k = len(res_list)
    post = post_scale is not None
    s = jnp.asarray(post_scale, F32).reshape(1, N) if post else jnp.ones((1, N), F32)
    t = jnp.asarray(post_shift, F32).reshape(1, N) if post else jnp.zeros((1, N), F32)
    call = _build_combine_ln(k, BW, T, N, float(eps), bool(post))
    return call(pw.astype(F32),
                *[r.astype(F32) for r in res_list],
                x.astype(F32),
                gamma.reshape(1, N).astype(F32),
                beta.reshape(1, N).astype(F32),
                s, t)


# ---------------------------------------------------------------------------
# Embeddings
# ---------------------------------------------------------------------------
def token_embedding(x, w):
    """TokenEmbedding: Conv1d(k=3, circular pad, no bias). x:(B,T,Cin), w:(3,Cin,D).
    (tiny operand; im2col blowup here is ~14KB so it stays in the glue)"""
    B, T, Cin = x.shape
    D = w.shape[-1]
    xp = jnp.concatenate([x[:, -1:, :], x, x[:, :1, :]], axis=1)
    cols = [xp[:, d:d + T, :] for d in range(3)]
    pat = jnp.stack(cols, axis=2).reshape(B * T, 3 * Cin)
    out = pallas_linear(pat, w.reshape(3 * Cin, D), jnp.zeros((D,), F32))
    return out.reshape(B, T, D)


def positional_embedding(T, d_model):
    position = np.arange(T, dtype=np.float32)[:, None]
    div_term = np.exp(np.arange(0, d_model, 2, dtype=np.float32)
                      * -(math.log(10000.0) / d_model))
    pe = np.zeros((T, d_model), np.float32)
    pe[:, 0::2] = np.sin(position * div_term)
    pe[:, 1::2] = np.cos(position * div_term)
    return jnp.asarray(pe)


# ---------------------------------------------------------------------------
# TimesBlock
# ---------------------------------------------------------------------------
def fft_for_period(x, k):
    # TODO(synk): torch.fft.rfft / topk stay in plain JAX (XLA FFT); the host pull of
    # the top-k indices mirrors torch's `.detach().cpu().numpy()` — the periods define
    # tensor shapes, so this remains a host round-trip (un-jittable, as in PyTorch).
    xf = jnp.fft.rfft(x, axis=1)
    amp = jnp.abs(xf)
    freq = amp.mean(axis=0).mean(axis=-1)
    freq = freq.at[0].set(0.0)
    _, top = lax.top_k(freq, k)
    top_np = np.asarray(top)
    T = x.shape[1]
    periods = [max(1, T // max(1, int(t))) for t in top_np]
    period_weight = amp.mean(axis=-1)[:, top]          # (BW, k)
    return periods, period_weight


def times_block_apply(enc, blk, k, T):
    """All k period branches (conv1+GELU+conv2) of one TimesBlock in one Pallas call."""
    BW, _, N = enc.shape
    periods, period_weight = fft_for_period(enc, k)
    kmax = blk['kmax']
    PAD = (kmax - 1) // 2
    Cff = blk['w1'].shape[-1]
    Cout = blk['w2'].shape[-1]

    geoms, rws, xs, masks = [], [], [], []
    for p in periods:
        length = T if T % p == 0 else (T // p + 1) * p
        Hp, Wp = length // p, p
        Hpp, Wpp = Hp + 2 * PAD, Wp + 2 * PAD
        Rpw = Hpp * Wpp
        base = PAD * Wpp + PAD                  # logical halo before the data
        start = _round_up(base, 8)              # 8-aligned data start in the buffer
        rw = _round_up(start + base + Rpw, 8)   # total rows (data + halos)

        if length == T:
            xo = enc
        else:
            xo = jnp.concatenate(
                [enc, jnp.zeros((BW, length - T, N), enc.dtype)], axis=1)
        grid4 = xo.reshape(BW, Hp, Wp, N)                                # NHWC
        gp = jnp.pad(grid4, ((0, 0), (PAD, PAD), (PAD, PAD), (0, 0)))    # 'same' pad
        flat = gp.reshape(BW, Rpw, N)
        flat = jnp.pad(flat, ((0, 0), (start, rw - start - Rpw), (0, 0)))

        ii = np.arange(Rpw) // Wpp
        jj = np.arange(Rpw) % Wpp
        m = ((ii >= PAD) & (ii < Hpp - PAD) & (jj >= PAD) & (jj < Wpp - PAD))
        mask = jnp.asarray(m.astype(np.float32).reshape(Rpw, 1))

        geoms.append((Wpp, Rpw, start, base))
        rws.append(rw)
        xs.append(flat)
        masks.append(mask)

    call = _build_inception_call(tuple(geoms), tuple(rws), kmax, N, Cff, Cout, BW)
    outs = call(*xs, *masks, blk['w1'], blk['b1'], blk['w2'], blk['b2'])
    if not isinstance(outs, (list, tuple)):
        outs = (outs,)

    res_list = []
    for out, p, (Wpp, Rpw, start, base) in zip(outs, periods, geoms):
        length = T if T % p == 0 else (T // p + 1) * p
        Hp, Wp = length // p, p
        Hpp = Hp + 2 * PAD
        o4 = out.reshape(BW, Hpp, Wpp, Cout)[:, PAD:PAD + Hp, PAD:PAD + Wp, :]
        res_list.append(o4.reshape(BW, length, Cout)[:, :T, :])
    pw = jax.nn.softmax(period_weight, axis=1)           # (BW, k)
    return res_list, pw


# ---------------------------------------------------------------------------
# LSTM head
# ---------------------------------------------------------------------------
def lstm_forward(x, layers_params):
    # TODO(synk): LSTM recurrence (hidden=3) is tiny & strictly sequential; plain lax.scan.
    inp = x
    for (w_ih, w_hh, b_ih, b_hh) in layers_params:
        H = w_hh.shape[1]
        Bsz = inp.shape[0]

        def step(carry, xt, w_ih=w_ih, w_hh=w_hh, b_ih=b_ih, b_hh=b_hh):
            h, c = carry
            gates = xt @ w_ih.T + h @ w_hh.T + b_ih + b_hh
            i, f, g, o = jnp.split(gates, 4, axis=-1)
            i = jax.nn.sigmoid(i)
            f = jax.nn.sigmoid(f)
            g = jnp.tanh(g)
            o = jax.nn.sigmoid(o)
            c = f * c + i * g
            h = o * jnp.tanh(c)
            return (h, c), h

        h0 = jnp.zeros((Bsz, H), F32)
        c0 = jnp.zeros((Bsz, H), F32)
        _, ys = lax.scan(step, (h0, c0), jnp.swapaxes(inp, 0, 1))
        inp = jnp.swapaxes(ys, 0, 1)
    return inp


# ---------------------------------------------------------------------------
# Model forward
# ---------------------------------------------------------------------------
def model_forward(x, params, cfg):
    B, T, N = x.shape
    stride, window_size = 50, 100
    window_nums = (T - window_size + stride) // stride
    windows = [x[:, i:i + window_size, :] for i in range(0, T - window_size + 1, stride)]
    aw = jnp.stack(windows, axis=0)                                   # (nw, B, 100, N)
    aw = jnp.transpose(aw, (1, 0, 2, 3)).reshape(-1, window_size, N)  # (B*nw, 100, N)

    # DataEmbedding (x_mark=None): TokenEmbedding conv (Pallas matmul) + positional emb.
    enc = token_embedding(aw, params['tok_w']) + params['pos_pe'][None]

    d_model = cfg['d_model']
    n_layers = len(params['blocks'])
    # eval-mode BatchNorm1d folded into per-channel affine (fused into kernels below)
    s1 = params['bn1_w'] / jnp.sqrt(params['bn1_rv'] + 1e-5)
    t1 = params['bn1_b'] - params['bn1_rm'] * s1

    for li, blk in enumerate(params['blocks']):
        res_list, pw = times_block_apply(enc, blk, cfg['top_k'], window_size)
        last = (li == n_layers - 1)
        enc = pallas_combine_layernorm(
            res_list, pw, enc, params['ln_g'], params['ln_b'],
            post_scale=(s1 if last else None),
            post_shift=(t1 if last else None))           # last layer: +BN1+GELU fused

    BW = enc.shape[0]
    out = enc.reshape(BW, window_size * d_model)
    # FC + BN2 (eval) + GELU fused in one Pallas kernel
    s2 = params['bn2_w'] / jnp.sqrt(params['bn2_rv'] + 1e-5)
    t2 = params['bn2_b'] - params['bn2_rm'] * s2
    out = pallas_linear(out, params['fc_w'], params['fc_b'],
                        gelu=True, scale=s2, shift=t2)    # (BW, 3)

    # per-sample sequences: rows [i*wn, (i+1)*wn - 1)  (last window dropped, as in torch)
    seqs = jnp.stack(
        [out[i * window_nums:(i + 1) * window_nums - 1] for i in range(B)], axis=0)
    lstm_out = lstm_forward(seqs, params['lstm'])
    last_h = lstm_out[:, -1, :]
    logits = pallas_linear(last_h, params['proj_w'], params['proj_b'])
    return logits


# ---------------------------------------------------------------------------
# Deterministic synthetic parameter init
# ---------------------------------------------------------------------------
def _init_inception(keys, cin, cout, num_kernels):
    # mean of zero-padded kernels == mean of the per-kernel-size 'same' convs
    kmax = 2 * num_kernels - 1
    w_avg = jnp.zeros((kmax, kmax, cin, cout), F32)
    b_avg = jnp.zeros((cout,), F32)
    for i in range(num_kernels):
        ks = 2 * i + 1
        off = (kmax - ks) // 2
        wi = jax.random.normal(next(keys), (ks, ks, cin, cout), F32) * 0.1
        bi = jax.random.normal(next(keys), (cout,), F32) * 0.1
        w_avg = w_avg.at[off:off + ks, off:off + ks, :, :].add(wi / num_kernels)
        b_avg = b_avg + bi / num_kernels
    # flattened layout expected by the fused kernel: rows = tap*(cin) + c
    return w_avg.reshape(kmax * kmax * cin, cout), b_avg.reshape(1, cout), kmax


def init_params(key, cfg):
    d_model, d_ff = cfg['d_model'], cfg['d_ff']
    enc_in, nk = cfg['enc_in'], cfg['num_kernels']
    el, ncls = cfg['e_layers'], cfg['num_class']
    seq_len = 100
    keys = iter(jax.random.split(key, 256))

    def nrm(shape, scale=0.1):
        return jax.random.normal(next(keys), shape, F32) * scale

    p = {}
    p['tok_w'] = nrm((3, enc_in, d_model))
    p['pos_pe'] = positional_embedding(seq_len, d_model)
    p['ln_g'] = jnp.ones((d_model,), F32)      # PyTorch LayerNorm defaults
    p['ln_b'] = jnp.zeros((d_model,), F32)
    blocks = []
    for _ in range(el):
        w1, b1, kmax = _init_inception(keys, d_model, d_ff, nk)
        w2, b2, _ = _init_inception(keys, d_ff, d_model, nk)
        blocks.append(dict(w1=w1, b1=b1, w2=w2, b2=b2, kmax=kmax))
    p['blocks'] = blocks
    # BatchNorm1d (eval) synthetic parameters / running stats
    p['bn1_w'] = 1.0 + nrm((d_model,))
    p['bn1_b'] = nrm((d_model,))
    p['bn1_rm'] = nrm((d_model,))
    p['bn1_rv'] = 0.5 + jax.random.uniform(next(keys), (d_model,), F32)
    p['bn2_w'] = 1.0 + nrm((3,))
    p['bn2_b'] = nrm((3,))
    p['bn2_rm'] = nrm((3,))
    p['bn2_rv'] = 0.5 + jax.random.uniform(next(keys), (3,), F32)
    p['fc_w'] = nrm((seq_len * d_model, 3), 0.02)
    p['fc_b'] = nrm((3,))
    lstm = []
    for _ in range(el):
        lstm.append((nrm((12, 3)), nrm((12, 3)), nrm((12,)), nrm((12,))))
    p['lstm'] = lstm
    p['proj_w'] = nrm((3, ncls))
    p['proj_b'] = nrm((ncls,))
    # NOTE: SelfAttention(d_model) is instantiated in the PyTorch module but never
    # used in forward(), so no parameters are needed for it here.
    return p


if __name__ == "__main__":
    cfg = dict(enc_in=4, d_model=16, d_ff=32, top_k=2, num_kernels=2,
               e_layers=2, num_class=3, pred_len=0)
    key = jax.random.PRNGKey(0)
    pkey, xkey = jax.random.split(key)
    params = init_params(pkey, cfg)

    B, T, N = 2, 200, cfg['enc_in']          # -> window_nums = 3, B*nw = 6 windows
    x = jax.random.normal(xkey, (B, T, N), F32)

    out = model_forward(x, params, cfg)
    out = jax.block_until_ready(out)
    assert out.shape == (B, cfg['num_class'])
    assert bool(jnp.all(jnp.isfinite(out)))
    print("KERNEL_OK")
</pallas_src>

<mosaic_0001>
module attributes {stable_mosaic.version = 11 : i64} {
  func.func @_linear_kernel(%arg0: i32, %arg1: memref<256x12xf32, #tpu.memory_space<vmem>>, %arg2: memref<12x16xf32, #tpu.memory_space<vmem>>, %arg3: memref<1x16xf32, #tpu.memory_space<vmem>>, %arg4: memref<1x16xf32, #tpu.memory_space<vmem>>, %arg5: memref<1x16xf32, #tpu.memory_space<vmem>>, %arg6: memref<256x16xf32, #tpu.memory_space<vmem>>) attributes {dimension_semantics = [#tpu.dimension_semantics<parallel>], iteration_bounds = array<i64: 3>, scalar_prefetch = 0 : i64, scratch_operands = 0 : i64, tpu.core_type = #tpu.core_type<tc>, window_params = [{transform_indices = @transform_0, window_bounds = array<i64: 256, 12>}, {pipeline_mode = #tpu.pipeline_mode<synchronous>, transform_indices = @transform_1, window_bounds = array<i64: 12, 16>}, {pipeline_mode = #tpu.pipeline_mode<synchronous>, transform_indices = @transform_2, window_bounds = array<i64: 1, 16>}, {pipeline_mode = #tpu.pipeline_mode<synchronous>, transform_indices = @transform_3, window_bounds = array<i64: 1, 16>}, {pipeline_mode = #tpu.pipeline_mode<synchronous>, transform_indices = @transform_4, window_bounds = array<i64: 1, 16>}, {transform_indices = @transform_5, window_bounds = array<i64: 256, 16>}]} {
    %c0 = arith.constant 0 : index
    %c0_0 = arith.constant 0 : index
    %0 = vector.load %arg1[%c0, %c0_0] : memref<256x12xf32, #tpu.memory_space<vmem>>, vector<256x12xf32>
    %c0_1 = arith.constant 0 : index
    %c0_2 = arith.constant 0 : index
    %1 = vector.load %arg2[%c0_1, %c0_2] : memref<12x16xf32, #tpu.memory_space<vmem>>, vector<12x16xf32>
    %cst = arith.constant dense<0.000000e+00> : vector<256x16xf32>
    %2 = tpu.matmul %0, %1, %cst {dimension_numbers = #tpu.dot_dimension_numbers<[1], [0], [0], [1], [0, 0, 1, 1], [], []>} : vector<256x12xf32>, vector<12x16xf32>, vector<256x16xf32> -> vector<256x16xf32>
    %c0_3 = arith.constant 0 : index
    %c0_4 = arith.constant 0 : index
    %3 = vector.load %arg3[%c0_3, %c0_4] : memref<1x16xf32, #tpu.memory_space<vmem>>, vector<1x16xf32>
    %4 = vector.broadcast %3 : vector<1x16xf32> to vector<256x16xf32>
    %5 = arith.addf %2, %4 : vector<256x16xf32>
    %c0_5 = arith.constant 0 : index
    %c0_6 = arith.constant 0 : index
    %6 = vector.load %arg6[%c0_5, %c0_6] : memref<256x16xf32, #tpu.memory_space<vmem>>, vector<256x16xf32>
    tpu.vector_store %arg6[%c0_5, %c0_6], %5 {strides = array<i32>} : memref<256x16xf32, #tpu.memory_space<vmem>>, vector<256x16xf32>,
    return
  }
  func.func @transform_0(%arg0: i32) -> (i32, i32) {
    %c0_i32 = arith.constant 0 : i32
    %c0_i32_0 = arith.constant 0 : i32
    return %arg0, %c0_i32 : i32, i32
  }
  func.func @transform_1(%arg0: i32) -> (i32, i32) {
    %c0_i32 = arith.constant 0 : i32
    %c0_i32_0 = arith.constant 0 : i32
    %c0_i32_1 = arith.constant 0 : i32
    return %c0_i32, %c0_i32_0 : i32, i32
  }
  func.func @transform_2(%arg0: i32) -> (i32, i32) {
    %c0_i32 = arith.constant 0 : i32
    %c0_i32_0 = arith.constant 0 : i32
    %c0_i32_1 = arith.constant 0 : i32
    return %c0_i32, %c0_i32_0 : i32, i32
  }
  func.func @transform_3(%arg0: i32) -> (i32, i32) {
    %c0_i32 = arith.constant 0 : i32
    %c0_i32_0 = arith.constant 0 : i32
    %c0_i32_1 = arith.constant 0 : i32
    return %c0_i32, %c0_i32_0 : i32, i32
  }
  func.func @transform_4(%arg0: i32) -> (i32, i32) {
    %c0_i32 = arith.constant 0 : i32
    %c0_i32_0 = arith.constant 0 : i32
    %c0_i32_1 = arith.constant 0 : i32
    return %c0_i32, %c0_i32_0 : i32, i32
  }
  func.func @transform_5(%arg0: i32) -> (i32, i32) {
    %c0_i32 = arith.constant 0 : i32
    %c0_i32_0 = arith.constant 0 : i32
    return %arg0, %c0_i32 : i32, i32
  }
}

</mosaic_0001>

<bundles_post_ra>
// kernel: tpu_custom_call.1
= control target key start
LH: loop header
LB: loop body
LE: loop exit
PB: predicated region body
PF: predicated region fallthrough
CT: control target
= control target key end

     0   :  { %s871_s18 = smov 0   ;;  %s1070_s0 = inlined_call_operand.vmem [shape: f32[768,12], index: 0, kind: input, shape index: {}]   ;;  %s1071_s1 = inlined_call_operand.vmem [shape: f32[12,16], index: 1, kind: input, shape index: {}]   ;;  %s1072_s2 = inlined_call_operand.vmem [shape: f32[1,16], index: 2, kind: input, shape index: {}]   ;;  %s1073_s3 = inlined_call_operand.vmem [shape: f32[1,16], index: 3, kind: input, shape index: {}]   ;;  %s1074_s4 = inlined_call_operand.vmem [shape: f32[1,16], index: 4, kind: input, shape index: {}]   ;;  %s1075_s5 = inlined_call_operand.vmem [shape: f32[768,16], index: 5, kind: output, shape index: {}]  }
   0x1 LB: > { %s684_s19 = sadd.s32 4294967295, %s838_s18   ;;  %p688_p0 = scmp.ge.s32.totalorder %s838_s18, 1  ;;  %s838_s18 = sphi %s871_s18, %s15_s18  }
   0x2   : > { %p188_p1 = scmp.lt.s32.totalorder %s838_s18, 4 }
   0x4   : > { %p189_p2 = pnand %p688_p0, %p188_p1 }
   0x5   : > { %v260_v0 = vld [vmem:[%s1071_s1] sm:$0xff] (!%p189_p2)  ;;  %v261_v1 = vld [vmem:[%s1071_s1 + $0x8] sm:$0xf] (!%p189_p2)  ;;  %vm366_vm0 = vcmask (!%p189_p2), 1043456   ;;  %s689_s22 = sshll.u32 (!%p189_p2), %s684_s19, 5  ;;  %vm840_vm1 = vmmov (!%p189_p2), 1  }
   0x6   : > { %192 = sbr.rel (%p189_p2) target bundleno = 263 (0x107), region = 40  ;;  %v815_v2 = vpack.c.bf16 (!%p189_p2), %v261_v1, %v260_v0  ;;  %vm816_vm2 = vmpackc.low (!%p189_p2), %vm366_vm0, %vm840_vm1  ;;  %p217_p3 = scmp.lt.s32.totalorder (!%p189_p2), %s689_s22, 95  ;;  %vm269_vm3 = vcmask (!%p189_p2), 97280   ;;  %v962_v35 = vld [vmem:[%s1072_s2] ss:$0 sm:$0xff] (!%p189_p2)  ;;  %vm595_vm4 = vcmask (!%p189_p2), 130048  }
   0x8   : > { %817 = vmatprep.subr.msk.bf16.mxu0 (!%p189_p2), %vm816_vm2, %v815_v2  ;;  %821 = vmatprep.subr.msk.bf16.mxu1 (!%p189_p2), %vm816_vm2, %v815_v2 }
   0x9   : > { %820 = vmatpush3.bf16.msk.msra.mxu0 (!%p189_p2), %vm816_vm2, %v815_v2  ;;  %822 = vmatpush3.bf16.msk.msra.mxu1 (!%p189_p2), %vm816_vm2, %v815_v2 }
   0xd   : > { %s1077_s22 = smov (!%p217_p3, %s689_s22), 95 }
   0xe   : > { %s690_s23 = sshll.u32 %s1077_s22, 3 }
   0xf   : > { %s893_s26 = scalar_lea.vmem %s1070_s0, %s690_s23  ;;  %s969_s6 = scalar_lea.vmem %s1075_s5, %s690_s23 }
  0x10   : > { %v228_v3 = vld [vmem:[%s893_s26] sm:$0xff]  ;;  %v229_v5 = vld [vmem:[%s893_s26 + $0x8] sm:$0xff]  ;;  %v230_v7 = vld [vmem:[%s893_s26 + $0x10] sm:$0xff] }
  0x11   : > { %v244_v4 = vld [vmem:[%s893_s26 + $0x80] sm:$0xff]  ;;  %767 = vmatprep.mubr.msk.f32.mxu0 %vm269_vm3, %v228_v3  ;;  %v245_v6 = vld [vmem:[%s893_s26 + $0x88] sm:$0xff]  ;;  %v246_v8 = vld [vmem:[%s893_s26 + $0x90] sm:$0xff] }
  0x12   : > { %791 = vmatprep.mubr.msk.f32.mxu1 %vm269_vm3, %v244_v4  ;;  %768 = vmatmul.mubr.msk.f32.vlgmr.msra.gmra.mrb[0].mxu0 %vm269_vm3, %v229_v5  ;;  %v231_v9 = vld [vmem:[%s893_s26 + $0x18] sm:$0xff]  ;;  %v232_v11 = vld [vmem:[%s893_s26 + $0x20] sm:$0xff]  ;;  %v233_v13 = vld [vmem:[%s893_s26 + $0x28] sm:$0xff] }
  0x13   : > { %792 = vmatmul.mubr.msk.f32.vlgmr.msra.gmra.mrb[0].mxu1 %vm269_vm3, %v245_v6  ;;  %770 = vmatprep.mubr.msk.f32.mxu0 %vm269_vm3, %v230_v7  ;;  %v247_v10 = vld [vmem:[%s893_s26 + $0x98] sm:$0xff]  ;;  %v248_v12 = vld [vmem:[%s893_s26 + $0xa0] sm:$0xff]  ;;  %v249_v14 = vld [vmem:[%s893_s26 + $0xa8] sm:$0xff] }
  0x14   : > { %794 = vmatprep.mubr.msk.f32.mxu1 %vm269_vm3, %v246_v8  ;;  %v234_v15 = vld [vmem:[%s893_s26 + $0x30] sm:$0xff]  ;;  %v235_v17 = vld [vmem:[%s893_s26 + $0x38] sm:$0xff]  ;;  %v236_v19 = vld [vmem:[%s893_s26 + $0x40] sm:$0xff] }
  0x15   : > { %v250_v16 = vld [vmem:[%s893_s26 + $0xb0] sm:$0xff]  ;;  %v251_v18 = vld [vmem:[%s893_s26 + $0xb8] sm:$0xff]  ;;  %v252_v20 = vld [vmem:[%s893_s26 + $0xc0] sm:$0xff] }
  0x16   : > { %771 = vmatmul.mubr.msk.f32.gmra.mrb[2].mxu0 %vm269_vm3, %v231_v9  ;;  %v237_v21 = vld [vmem:[%s893_s26 + $0x48] sm:$0xff]  ;;  %v238_v23 = vld [vmem:[%s893_s26 + $0x50] sm:$0xff]  ;;  %v239_v25 = vld [vmem:[%s893_s26 + $0x58] sm:$0xff] }
  0x17   : > { %795 = vmatmul.mubr.msk.f32.gmra.mrb[2].mxu1 %vm269_vm3, %v247_v10  ;;  %773 = vmatprep.mubr.msk.f32.mxu0 %vm269_vm3, %v232_v11  ;;  %v253_v22 = vld [vmem:[%s893_s26 + $0xc8] sm:$0xff]  ;;  %v254_v24 = vld [vmem:[%s893_s26 + $0xd0] sm:$0xff]  ;;  %v255_v26 = vld [vmem:[%s893_s26 + $0xd8] sm:$0xff] }
  0x18   : > { %797 = vmatprep.mubr.msk.f32.mxu1 %vm269_vm3, %v248_v12  ;;  %v240_v27 = vld [vmem:[%s893_s26 + $0x60] sm:$0xff]  ;;  %v241_v29 = vld [vmem:[%s893_s26 + $0x68] sm:$0xff]  ;;  %v242_v31 = vld [vmem:[%s893_s26 + $0x70] sm:$0xff] }
  0x19   : > { %v256_v28 = vld [vmem:[%s893_s26 + $0xe0] sm:$0xff]  ;;  %v257_v30 = vld [vmem:[%s893_s26 + $0xe8] sm:$0xff]  ;;  %v258_v32 = vld [vmem:[%s893_s26 + $0xf0] sm:$0xff] }
  0x1a   : > { %774 = vmatmul.mubr.msk.f32.gmra.mrb[4].mxu0 %vm269_vm3, %v233_v13  ;;  %v243_v33 = vld [vmem:[%s893_s26 + $0x78] sm:$0xff] }
  0x1b   : > { %798 = vmatmul.mubr.msk.f32.gmra.mrb[4].mxu1 %vm269_vm3, %v249_v14  ;;  %776 = vmatprep.mubr.msk.f32.mxu0 %vm269_vm3, %v234_v15  ;;  %v259_v34 = vld [vmem:[%s893_s26 + $0xf8] sm:$0xff] }
  0x1c   : > { %800 = vmatprep.mubr.msk.f32.mxu1 %vm269_vm3, %v250_v16 }
  0x1e   : > { %777 = vmatmul.mubr.msk.f32.gmra.mrb[6].mxu0 %vm269_vm3, %v235_v17 }
  0x1f   : > { %801 = vmatmul.mubr.msk.f32.gmra.mrb[6].mxu1 %vm269_vm3, %v251_v18  ;;  %779 = vmatprep.mubr.msk.f32.mxu0 %vm269_vm3, %v236_v19 }
  0x20   : > { %803 = vmatprep.mubr.msk.f32.mxu1 %vm269_vm3, %v252_v20 }
  0x22   : > { %780 = vmatmul.mubr.msk.f32.gmra.mrb[8].mxu0 %vm269_vm3, %v237_v21 }
  0x23   : > { %804 = vmatmul.mubr.msk.f32.gmra.mrb[8].mxu1 %vm269_vm3, %v253_v22  ;;  %782 = vmatprep.mubr.msk.f32.mxu0 %vm269_vm3, %v238_v23 }
  0x24   : > { %806 = vmatprep.mubr.msk.f32.mxu1 %vm269_vm3, %v254_v24 }
  0x26   : > { %783 = vmatmul.mubr.msk.f32.gmra.mrb[10].mxu0 %vm269_vm3, %v239_v25 }
  0x27   : > { %807 = vmatmul.mubr.msk.f32.gmra.mrb[10].mxu1 %vm269_vm3, %v255_v26  ;;  %785 = vmatprep.mubr.msk.f32.mxu0 %vm269_vm3, %v240_v27 }
  0x28   : > { %809 = vmatprep.mubr.msk.f32.mxu1 %vm269_vm3, %v256_v28 }
  0x2a   : > { %786 = vmatmul.mubr.msk.f32.gmra.mrb[12].mxu0 %vm269_vm3, %v241_v29 }
  0x2b   : > { %810 = vmatmul.mubr.msk.f32.gmra.mrb[12].mxu1 %vm269_vm3, %v257_v30  ;;  %788 = vmatprep.mubr.msk.f32.mxu0 %vm269_vm3, %v242_v31 }
  0x2c   : > { %812 = vmatprep.mubr.msk.f32.mxu1 %vm269_vm3, %v258_v32 }
  0x2e   : > { %789 = vmatmul.mubr.msk.f32.gmra.mrb[14].mxu0 %vm269_vm3, %v243_v33 }
  0x2f   : > { %813 = vmatmul.mubr.msk.f32.gmra.mrb[14].mxu1 %vm269_vm3, %v259_v34 }
  0xe5   : > { %v769_v36 = vpop.f32.mrb[0].mxu0 }
  0xe6   : > { %v793_v37 = vpop.f32.mrb[0].mxu1  ;;  %v442_v38 = vadd.f32 %v769_v36, %v962_v35  ;;  %v436_v40 = vpop.f32.mrb[1].mxu0 }
  0xe7   : > { %v522_v39 = vadd.f32 %v793_v37, %v962_v35  ;;  %v516_v41 = vpop.f32.mrb[1].mxu1  ;;  %v437_v42 = vadd.f32 %v962_v35, %v436_v40 }
  0xe8   : > { %v517_v43 = vadd.f32 %v962_v35, %v516_v41  ;;  %597 = vst.msk [vmem:[%s969_s6 + $0x8] sm:$0xff] %vm595_vm4, %v442_v38 }
  0xe9   : > { %613 = vst.msk [vmem:[%s969_s6 + $0x88] sm:$0xff] %vm595_vm4, %v522_v39  ;;  %596 = vst.msk [vmem:[%s969_s6] sm:$0xff] %vm595_vm4, %v437_v42  ;;  %v772_v44 = vpop.f32.mrb[2].mxu0 }
  0xea   : > { %612 = vst.msk [vmem:[%s969_s6 + $0x80] sm:$0xff] %vm595_vm4, %v517_v43  ;;  %v796_v45 = vpop.f32.mrb[2].mxu1  ;;  %v452_v46 = vadd.f32 %v772_v44, %v962_v35  ;;  %v446_v48 = vpop.f32.mrb[3].mxu0 }
  0xeb   : > { %v532_v47 = vadd.f32 %v796_v45, %v962_v35  ;;  %v526_v49 = vpop.f32.mrb[3].mxu1  ;;  %v447_v50 = vadd.f32 %v962_v35, %v446_v48 }
  0xec   : > { %v527_v51 = vadd.f32 %v962_v35, %v526_v49  ;;  %599 = vst.msk [vmem:[%s969_s6 + $0x18] sm:$0xff] %vm595_vm4, %v452_v46 }
  0xed   : > { %615 = vst.msk [vmem:[%s969_s6 + $0x98] sm:$0xff] %vm595_vm4, %v532_v47  ;;  %598 = vst.msk [vmem:[%s969_s6 + $0x10] sm:$0xff] %vm595_vm4, %v447_v50  ;;  %v775_v52 = vpop.f32.mrb[4].mxu0 }
  0xee   : > { %614 = vst.msk [vmem:[%s969_s6 + $0x90] sm:$0xff] %vm595_vm4, %v527_v51  ;;  %v799_v53 = vpop.f32.mrb[4].mxu1  ;;  %v462_v54 = vadd.f32 %v775_v52, %v962_v35  ;;  %v456_v56 = vpop.f32.mrb[5].mxu0 }
  0xef   : > { %v542_v55 = vadd.f32 %v799_v53, %v962_v35  ;;  %v536_v57 = vpop.f32.mrb[5].mxu1  ;;  %v457_v58 = vadd.f32 %v962_v35, %v456_v56 }
  0xf0   : > { %v537_v59 = vadd.f32 %v962_v35, %v536_v57  ;;  %601 = vst.msk [vmem:[%s969_s6 + $0x28] sm:$0xff] %vm595_vm4, %v462_v54 }
  0xf1   : > { %617 = vst.msk [vmem:[%s969_s6 + $0xa8] sm:$0xff] %vm595_vm4, %v542_v55  ;;  %600 = vst.msk [vmem:[%s969_s6 + $0x20] sm:$0xff] %vm595_vm4, %v457_v58  ;;  %v778_v60 = vpop.f32.mrb[6].mxu0 }
  0xf2   : > { %616 = vst.msk [vmem:[%s969_s6 + $0xa0] sm:$0xff] %vm595_vm4, %v537_v59  ;;  %v802_v61 = vpop.f32.mrb[6].mxu1  ;;  %v472_v62 = vadd.f32 %v778_v60, %v962_v35  ;;  %v466_v0 = vpop.f32.mrb[7].mxu0 }
  0xf3   : > { %v552_v63 = vadd.f32 %v802_v61, %v962_v35  ;;  %v546_v1 = vpop.f32.mrb[7].mxu1  ;;  %v467_v2 = vadd.f32 %v962_v35, %v466_v0 }
  0xf4   : > { %v547_v3 = vadd.f32 %v962_v35, %v546_v1  ;;  %603 = vst.msk [vmem:[%s969_s6 + $0x38] sm:$0xff] %vm595_vm4, %v472_v62 }
  0xf5   : > { %619 = vst.msk [vmem:[%s969_s6 + $0xb8] sm:$0xff] %vm595_vm4, %v552_v63  ;;  %602 = vst.msk [vmem:[%s969_s6 + $0x30] sm:$0xff] %vm595_vm4, %v467_v2  ;;  %v781_v4 = vpop.f32.mrb[8].mxu0 }
  0xf6   : > { %618 = vst.msk [vmem:[%s969_s6 + $0xb0] sm:$0xff] %vm595_vm4, %v547_v3  ;;  %v805_v5 = vpop.f32.mrb[8].mxu1  ;;  %v482_v6 = vadd.f32 %v781_v4, %v962_v35  ;;  %v476_v8 = vpop.f32.mrb[9].mxu0 }
  0xf7   : > { %v562_v7 = vadd.f32 %v805_v5, %v962_v35  ;;  %v556_v9 = vpop.f32.mrb[9].mxu1  ;;  %v477_v10 = vadd.f32 %v962_v35, %v476_v8 }
  0xf8   : > { %v557_v11 = vadd.f32 %v962_v35, %v556_v9  ;;  %605 = vst.msk [vmem:[%s969_s6 + $0x48] sm:$0xff] %vm595_vm4, %v482_v6 }
  0xf9   : > { %621 = vst.msk [vmem:[%s969_s6 + $0xc8] sm:$0xff] %vm595_vm4, %v562_v7  ;;  %604 = vst.msk [vmem:[%s969_s6 + $0x40] sm:$0xff] %vm595_vm4, %v477_v10  ;;  %v784_v12 = vpop.f32.mrb[10].mxu0 }
  0xfa   : > { %620 = vst.msk [vmem:[%s969_s6 + $0xc0] sm:$0xff] %vm595_vm4, %v557_v11  ;;  %v808_v13 = vpop.f32.mrb[10].mxu1  ;;  %v492_v14 = vadd.f32 %v784_v12, %v962_v35  ;;  %v486_v16 = vpop.f32.mrb[11].mxu0 }
  0xfb   : > { %v572_v15 = vadd.f32 %v808_v13, %v962_v35  ;;  %v566_v17 = vpop.f32.mrb[11].mxu1  ;;  %v487_v18 = vadd.f32 %v962_v35, %v486_v16 }
  0xfc   : > { %v567_v19 = vadd.f32 %v962_v35, %v566_v17  ;;  %607 = vst.msk [vmem:[%s969_s6 + $0x58] sm:$0xff] %vm595_vm4, %v492_v14 }
  0xfd   : > { %623 = vst.msk [vmem:[%s969_s6 + $0xd8] sm:$0xff] %vm595_vm4, %v572_v15  ;;  %606 = vst.msk [vmem:[%s969_s6 + $0x50] sm:$0xff] %vm595_vm4, %v487_v18  ;;  %v787_v20 = vpop.f32.mrb[12].mxu0 }
  0xfe   : > { %622 = vst.msk [vmem:[%s969_s6 + $0xd0] sm:$0xff] %vm595_vm4, %v567_v19  ;;  %v811_v21 = vpop.f32.mrb[12].mxu1  ;;  %v502_v22 = vadd.f32 %v787_v20, %v962_v35  ;;  %v496_v24 = vpop.f32.mrb[13].mxu0 }
  0xff   : > { %v582_v23 = vadd.f32 %v811_v21, %v962_v35  ;;  %v576_v25 = vpop.f32.mrb[13].mxu1  ;;  %v497_v26 = vadd.f32 %v962_v35, %v496_v24 }
 0x100   : > { %v577_v27 = vadd.f32 %v962_v35, %v576_v25  ;;  %609 = vst.msk [vmem:[%s969_s6 + $0x68] sm:$0xff] %vm595_vm4, %v502_v22 }
 0x101   : > { %625 = vst.msk [vmem:[%s969_s6 + $0xe8] sm:$0xff] %vm595_vm4, %v582_v23  ;;  %608 = vst.msk [vmem:[%s969_s6 + $0x60] sm:$0xff] %vm595_vm4, %v497_v26  ;;  %v790_v28 = vpop.f32.mrb[14].mxu0 }
 0x102   : > { %624 = vst.msk [vmem:[%s969_s6 + $0xe0] sm:$0xff] %vm595_vm4, %v577_v27  ;;  %v814_v29 = vpop.f32.mrb[14].mxu1  ;;  %v512_v30 = vadd.f32 %v790_v28, %v962_v35  ;;  %v506_v32 = vpop.f32.mrb[15].mxu0 }
 0x103   : > { %v592_v31 = vadd.f32 %v814_v29, %v962_v35  ;;  %v586_v33 = vpop.f32.mrb[15].mxu1  ;;  %v507_v34 = vadd.f32 %v962_v35, %v506_v32 }
 0x104   : > { %v587_v36 = vadd.f32 %v962_v35, %v586_v33  ;;  %611 = vst.msk [vmem:[%s969_s6 + $0x78] sm:$0xff] %vm595_vm4, %v512_v30 }
 0x105   : > { %627 = vst.msk [vmem:[%s969_s6 + $0xf8] sm:$0xff] %vm595_vm4, %v592_v31  ;;  %610 = vst.msk [vmem:[%s969_s6 + $0x70] sm:$0xff] %vm595_vm4, %v507_v34 }
 0x106   : > { %626 = vst.msk [vmem:[%s969_s6 + $0xf0] sm:$0xff] %vm595_vm4, %v587_v36 }
 0x107 PF: > { %s15_s18 = sadd.s32 1, %s838_s18  }
 0x108   : > { %p12_p4 = scmp.ge.s32.totalorder %s15_s18, 5  }
 0x10a   :  { %14 = sbr.rel (!%p12_p4) target bundleno = 1 (0x1), region = 70 }

</bundles_post_ra>
